<compile_context>
chip_gen: v6e
topology: v6e:2x2x1
jax: 0.10.0
libtpu: 0.0.40
codegen_flags: <defaults>
</compile_context>

<pallas_src>
import jax
import jax.numpy as jnp
from jax import lax
from jax.experimental import pallas as pl
from jax.experimental.pallas import tpu as pltpu

STATE_DIM = 11      # Hopper-v3 observation dim
ACTION_DIM = 3      # Hopper-v3 action dim
MAX_ACTION = 1.0    # Hopper-v3 action_space.high[0]
H1, H2 = 64, 32

# ---- packed parameter layout: one (PACK_ROWS, 128) f32 buffer --------------
# Weights stored transposed (out x in); biases stored as a column at BIAS_COL.
W1T_ROW = 0          # rows [0, 64)    cols [0, 11)   = w1.T
W2T_ROW = 64         # rows [64, 96)   cols [0, 64)   = w2.T
W3T_ROW = 96         # rows [96, 99)   cols [0, 32)   = w3.T
BIAS_COL = 120       # b1 at rows [0,64), b2 at rows [64,96), b3 at rows [96,99)
PACK_ROWS, PACK_COLS = 104, 128


def _round_up(x, m):
    return (x + m - 1) // m * m


def pack_params(p):
    """Pack w1,b1,w2,b2,w3,b3 (transposed) into one lane-dense f32 buffer."""
    buf = jnp.zeros((PACK_ROWS, PACK_COLS), jnp.float32)
    buf = buf.at[W1T_ROW:W1T_ROW + H1, 0:STATE_DIM].set(p["w1"].T)
    buf = buf.at[W1T_ROW:W1T_ROW + H1, BIAS_COL].set(p["b1"].reshape(-1))
    buf = buf.at[W2T_ROW:W2T_ROW + H2, 0:H1].set(p["w2"].T)
    buf = buf.at[W2T_ROW:W2T_ROW + H2, BIAS_COL].set(p["b2"].reshape(-1))
    buf = buf.at[W3T_ROW:W3T_ROW + ACTION_DIM, 0:H2].set(p["w3"].T)
    buf = buf.at[W3T_ROW:W3T_ROW + ACTION_DIM, BIAS_COL].set(p["b3"].reshape(-1))
    return buf


def make_actor_kernel(tb, chunk, unroll=4):
    """Kernel over one (STATE_DIM, tb) batch tile; params VMEM-resident."""
    assert tb % chunk == 0
    n_chunks = tb // chunk

    def kernel(x_ref, p_ref, o_ref):
        # Static slices of the resident packed-parameter tile (tiny, per step).
        w1t = p_ref[W1T_ROW:W1T_ROW + H1, 0:STATE_DIM]           # (64, 11)
        w2t = p_ref[W2T_ROW:W2T_ROW + H2, 0:H1]                  # (32, 64)
        w3t = p_ref[W3T_ROW:W3T_ROW + ACTION_DIM, 0:H2]          # ( 3, 32)
        # Bias broadcasts hoisted out of the chunk loop (no re-emitted
        # broadcast_in_dim per unrolled copy).
        b1b = jnp.broadcast_to(
            p_ref[W1T_ROW:W1T_ROW + H1, BIAS_COL:BIAS_COL + 1], (H1, chunk))
        b2b = jnp.broadcast_to(
            p_ref[W2T_ROW:W2T_ROW + H2, BIAS_COL:BIAS_COL + 1], (H2, chunk))
        b3b = jnp.broadcast_to(
            p_ref[W3T_ROW:W3T_ROW + ACTION_DIM, BIAS_COL:BIAS_COL + 1],
            (ACTION_DIM, chunk))

        def body(c, carry):
            col = pl.multiple_of(c * chunk, chunk)
            x = x_ref[:, pl.ds(col, chunk)]                      # (11, chunk)
            # Layer 1: (64,11) @ (11,chunk) + b1, ReLU
            a = jnp.dot(w1t, x, preferred_element_type=jnp.float32)
            a = jnp.maximum(a + b1b, 0.0)
            # Layer 2: (32,64) @ (64,chunk) + b2, ReLU
            a = jnp.dot(w2t, a, preferred_element_type=jnp.float32)
            a = jnp.maximum(a + b2b, 0.0)
            # Layer 3: (3,32) @ (32,chunk) + b3, tanh, scale
            a = jnp.dot(w3t, a, preferred_element_type=jnp.float32)
            y = MAX_ACTION * jnp.tanh(a + b3b)
            o_ref[:, pl.ds(col, chunk)] = y.astype(o_ref.dtype)  # lane-dense
            return carry

        lax.fori_loop(0, n_chunks, body, 0, unroll=min(unroll, n_chunks))

    return kernel


def _choose_tiles(B, tb_cap=4096):
    """Pick (tb, chunk, b_pad); batch is the lane axis (multiples of 128)."""
    b128 = _round_up(B, 128)
    tb = min(tb_cap, b128)
    # For larger batches, ensure the grid has >= 2 tiles so both TensorCores
    # on v7x can pick up work under dimension_semantics=("parallel",).
    if b128 >= 256 and tb >= b128:
        tb = _round_up(b128 // 2, 128)
    chunk = min(256, tb)
    tb = _round_up(tb, chunk)
    b_pad = _round_up(B, tb)
    return tb, chunk, b_pad


def actor_forward(state, params, *, tb_cap=4096):
    """state: (B, STATE_DIM) float32; params: dict of w1,b1,w2,b2,w3,b3."""
    B = state.shape[0]
    state = state.astype(jnp.float32)

    tb, chunk, b_pad = _choose_tiles(B, tb_cap)

    # Features-by-batch orientation: (STATE_DIM, b_pad), batch on the lane axis.
    if b_pad != B:
        state = jnp.pad(state, ((0, b_pad - B), (0, 0)))
    x_t = state.T                                   # (STATE_DIM, b_pad)

    packed = pack_params(params)

    # Tile-derived VMEM budget: double-buffered in/out tiles (sublane-padded),
    # resident params, activation headroom, plus slack; capped for v7x.
    vmem_bytes = (2 * 2 * (16 + 8) * tb * 4
                  + 2 * PACK_ROWS * PACK_COLS * 4
                  + 2 * (STATE_DIM + H1 + H2 + 8) * chunk * 4
                  + (4 << 20))
    vmem_bytes = int(min(max(vmem_bytes, 8 << 20), 28 << 20))

    cost = pl.CostEstimate(
        flops=2 * b_pad * (STATE_DIM * H1 + H1 * H2 + H2 * ACTION_DIM),
        transcendentals=b_pad * ACTION_DIM,
        bytes_accessed=b_pad * (STATE_DIM + ACTION_DIM) * 4
        + PACK_ROWS * PACK_COLS * 4,
    )

    out = pl.pallas_call(
        make_actor_kernel(tb, chunk),
        out_shape=jax.ShapeDtypeStruct((ACTION_DIM, b_pad), jnp.float32),
        grid=(b_pad // tb,),
        in_specs=[
            pl.BlockSpec((STATE_DIM, tb), lambda i: (0, i)),
            pl.BlockSpec((PACK_ROWS, PACK_COLS), lambda i: (0, 0)),
        ],
        out_specs=pl.BlockSpec((ACTION_DIM, tb), lambda i: (0, i)),
        compiler_params=pltpu.CompilerParams(
            dimension_semantics=("parallel",),
            vmem_limit_bytes=vmem_bytes,
        ),
        cost_estimate=cost,
    )(x_t, packed)

    # Back to the PyTorch (B, ACTION_DIM) convention; padded lanes sliced off.
    return out[:, :B].T


def init_params(key):
    """Deterministic init mirroring nn.Linear shapes (weights stored as (in, out))."""
    ks = jax.random.split(key, 6)

    def linear(kw, kb, fan_in, fan_out):
        bound = 1.0 / jnp.sqrt(float(fan_in))
        w = jax.random.uniform(kw, (fan_in, fan_out), jnp.float32, -bound, bound)
        b = jax.random.uniform(kb, (1, fan_out), jnp.float32, -bound, bound)
        return w, b

    w1, b1 = linear(ks[0], ks[1], STATE_DIM, H1)
    w2, b2 = linear(ks[2], ks[3], H1, H2)
    w3, b3 = linear(ks[4], ks[5], H2, ACTION_DIM)
    return {"w1": w1, "b1": b1, "w2": w2, "b2": b2, "w3": w3, "b3": b3}


def actor_ref(state, p):
    """Pure-JAX reference for correctness check."""
    a = jax.nn.relu(state @ p["w1"] + p["b1"])
    a = jax.nn.relu(a @ p["w2"] + p["b2"])
    return MAX_ACTION * jnp.tanh(a @ p["w3"] + p["b3"])


if __name__ == "__main__":
    key = jax.random.PRNGKey(0)
    pkey, xkey1, xkey2 = jax.random.split(key, 3)
    params = init_params(pkey)

    # Small inference batch (single tile, single chunk).
    B1 = 8
    state1 = jax.random.normal(xkey1, (B1, STATE_DIM), jnp.float32)
    out1 = jax.block_until_ready(actor_forward(state1, params))
    ref1 = actor_ref(state1, params)
    assert out1.shape == (B1, ACTION_DIM)
    assert jnp.allclose(out1, ref1, atol=1e-5, rtol=1e-5)

    # Non-multiple batch (exercises padding + 2-tile grid + chunk loop).
    B2 = 300
    state2 = jax.random.normal(xkey2, (B2, STATE_DIM), jnp.float32)
    out2 = jax.block_until_ready(actor_forward(state2, params))
    ref2 = actor_ref(state2, params)
    assert out2.shape == (B2, ACTION_DIM)
    assert jnp.allclose(out2, ref2, atol=1e-5, rtol=1e-5)

    print("KERNEL_OK")
</pallas_src>

<mosaic_0001>
module attributes {stable_mosaic.version = 11 : i64} {
  func.func @kernel(%arg0: i32, %arg1: memref<11x128xf32, #tpu.memory_space<vmem>>, %arg2: memref<104x128xf32, #tpu.memory_space<vmem>>, %arg3: memref<3x128xf32, #tpu.memory_space<vmem>>) attributes {dimension_semantics = [#tpu.dimension_semantics<parallel>], iteration_bounds = array<i64: 1>, scalar_prefetch = 0 : i64, scratch_operands = 0 : i64, tpu.core_type = #tpu.core_type<tc>, window_params = [{transform_indices = @transform_0, window_bounds = array<i64: 11, 128>}, {pipeline_mode = #tpu.pipeline_mode<synchronous>, transform_indices = @transform_1, window_bounds = array<i64: 104, 128>}, {transform_indices = @transform_2, window_bounds = array<i64: 3, 128>}]} {
    %c0 = arith.constant 0 : index
    %c0_0 = arith.constant 0 : index
    %0 = vector.load %arg2[%c0, %c0_0] : memref<104x128xf32, #tpu.memory_space<vmem>>, vector<64x11xf32>
    %c64 = arith.constant 64 : index
    %c0_1 = arith.constant 0 : index
    %1 = vector.load %arg2[%c64, %c0_1] : memref<104x128xf32, #tpu.memory_space<vmem>>, vector<32x64xf32>
    %c96 = arith.constant 96 : index
    %c0_2 = arith.constant 0 : index
    %2 = vector.load %arg2[%c96, %c0_2] : memref<104x128xf32, #tpu.memory_space<vmem>>, vector<3x32xf32>
    %c0_3 = arith.constant 0 : index
    %c120 = arith.constant 120 : index
    %3 = vector.load %arg2[%c0_3, %c120] : memref<104x128xf32, #tpu.memory_space<vmem>>, vector<64x1xf32>
    %4 = vector.shape_cast %3 : vector<64x1xf32> to vector<64x1xf32>
    %5 = vector.broadcast %4 : vector<64x1xf32> to vector<64x128xf32>
    %c64_4 = arith.constant 64 : index
    %c120_5 = arith.constant 120 : index
    %6 = vector.load %arg2[%c64_4, %c120_5] : memref<104x128xf32, #tpu.memory_space<vmem>>, vector<32x1xf32>
    %7 = vector.shape_cast %6 : vector<32x1xf32> to vector<32x1xf32>
    %8 = vector.broadcast %7 : vector<32x1xf32> to vector<32x128xf32>
    %c96_6 = arith.constant 96 : index
    %c120_7 = arith.constant 120 : index
    %9 = vector.load %arg2[%c96_6, %c120_7] : memref<104x128xf32, #tpu.memory_space<vmem>>, vector<3x1xf32>
    %10 = vector.shape_cast %9 : vector<3x1xf32> to vector<3x1xf32>
    %11 = vector.broadcast %10 : vector<3x1xf32> to vector<3x128xf32>
    %c0_i32 = arith.constant 0 : i32
    %c128_i32 = arith.constant 128 : i32
    %12 = arith.muli %c0_i32, %c128_i32 : i32
    %13 = tpu.assume_multiple %12, 128 : i32
    %c0_8 = arith.constant 0 : index
    %14 = arith.index_cast %13 : i32 to index
    %15 = vector.load %arg1[%c0_8, %14] : memref<11x128xf32, #tpu.memory_space<vmem>>, vector<11x128xf32>
    %cst = arith.constant dense<0.000000e+00> : vector<64x128xf32>
    %16 = tpu.matmul %0, %15, %cst {dimension_numbers = #tpu.dot_dimension_numbers<[1], [0], [0], [1], [0, 0, 1, 1], [], []>} : vector<64x11xf32>, vector<11x128xf32>, vector<64x128xf32> -> vector<64x128xf32>
    %17 = arith.addf %16, %5 : vector<64x128xf32>
    %cst_9 = arith.constant 0.000000e+00 : f32
    %18 = vector.broadcast %cst_9 : f32 to vector<64x128xf32>
    %19 = arith.maximumf %17, %18 : vector<64x128xf32>
    %cst_10 = arith.constant dense<0.000000e+00> : vector<32x128xf32>
    %20 = tpu.matmul %1, %19, %cst_10 {dimension_numbers = #tpu.dot_dimension_numbers<[1], [0], [0], [1], [0, 0, 1, 1], [], []>} : vector<32x64xf32>, vector<64x128xf32>, vector<32x128xf32> -> vector<32x128xf32>
    %21 = arith.addf %20, %8 : vector<32x128xf32>
    %cst_11 = arith.constant 0.000000e+00 : f32
    %22 = vector.broadcast %cst_11 : f32 to vector<32x128xf32>
    %23 = arith.maximumf %21, %22 : vector<32x128xf32>
    %cst_12 = arith.constant dense<0.000000e+00> : vector<3x128xf32>
    %24 = tpu.matmul %2, %23, %cst_12 {dimension_numbers = #tpu.dot_dimension_numbers<[1], [0], [0], [1], [0, 0, 1, 1], [], []>} : vector<3x32xf32>, vector<32x128xf32>, vector<3x128xf32> -> vector<3x128xf32>
    %25 = arith.addf %24, %11 : vector<3x128xf32>
    %26 = math.tanh %25 : vector<3x128xf32>
    %cst_13 = arith.constant 1.000000e+00 : f32
    %27 = vector.broadcast %cst_13 : f32 to vector<3x128xf32>
    %28 = arith.mulf %27, %26 : vector<3x128xf32>
    %c0_14 = arith.constant 0 : index
    %29 = arith.index_cast %13 : i32 to index
    %30 = vector.load %arg3[%c0_14, %29] : memref<3x128xf32, #tpu.memory_space<vmem>>, vector<3x128xf32>
    tpu.vector_store %arg3[%c0_14, %29], %28 {strides = array<i32>} : memref<3x128xf32, #tpu.memory_space<vmem>>, vector<3x128xf32>,
    %c1_i32 = arith.constant 1 : i32
    return
  }
  func.func @transform_0(%arg0: i32) -> (i32, i32) {
    %c0_i32 = arith.constant 0 : i32
    %c0_i32_0 = arith.constant 0 : i32
    return %c0_i32, %arg0 : i32, i32
  }
  func.func @transform_1(%arg0: i32) -> (i32, i32) {
    %c0_i32 = arith.constant 0 : i32
    %c0_i32_0 = arith.constant 0 : i32
    %c0_i32_1 = arith.constant 0 : i32
    return %c0_i32, %c0_i32_0 : i32, i32
  }
  func.func @transform_2(%arg0: i32) -> (i32, i32) {
    %c0_i32 = arith.constant 0 : i32
    %c0_i32_0 = arith.constant 0 : i32
    return %c0_i32, %arg0 : i32, i32
  }
}

</mosaic_0001>

<bundles_post_ra>
// kernel: tpu_custom_call.1
= control target key start
LH: loop header
LB: loop body
LE: loop exit
PB: predicated region body
PF: predicated region fallthrough
CT: control target
= control target key end

     0   :  { %7 = vsyncpa [#allocation3], 0  ;;  %s659_s0 = inlined_call_operand.hbm [shape: f32[11,128], index: 0, kind: input, shape index: {}]   ;;  %s660_s1 = inlined_call_operand.hbm [shape: f32[104,128], index: 1, kind: input, shape index: {}]   ;;  %s661_s2 = inlined_call_operand.hbm [shape: f32[3,128], index: 2, kind: output, shape index: {}]  }
   0x1   :  { %8 = vsyncpa [#allocation6], 0 }
   0x2   :  { %9 = vsyncpa [#allocation4], 0  ;;  %s611_s9 = smov [#allocation2]  }
   0x3   :  { %s15_s10 = sshll.u32 %s611_s9, 4  ;;  %s16_s10 = int_to_ptr.vmem [resolvable:$true] %s15_s10 }
   0x4   :  { %s553_s11 = scalar_lea.vmem %s16_s10, 256  ;;  %p558_p1 = scmp.lt.s32.totalorder %s16_s10, %s16_s10 }
   0x5   :  { %p554_p0 = scmp.ne.s32.totalorder %s16_s10, %s553_s11  ;;  %p559_p2 = scmp.lt.s32.totalorder %s553_s11, %s553_s11 }
   0x7   :  { %p560_p3 = por %p559_p2, %p558_p1 }
   0x9   :  { %p561_p4 = pnand %p560_p3, %p554_p0 }
   0xb   :  { %564 = shalt.err (!%p561_p4)
}
   0xc   :  { %s612_s12 = smov 128   ;;  %s613_s13 = smov 8  }
   0xd   :  { %21 = dma.hbm_to_vmem [thread:$0]  %s659_s0, 256, %s16_s10, [#allocation3], %s612_s12, %s612_s12, %s613_s13  }
   0xe   :  { %s614_s16 = smov [#allocation5]  }
   0xf   :  { %s27_s17 = sshll.u32 %s614_s16, 4  ;;  %s28_s17 = int_to_ptr.vmem [resolvable:$true] %s27_s17 }
  0x10   :  { %s573_s18 = scalar_lea.vmem %s28_s17, 1664  ;;  %p578_p6 = scmp.lt.s32.totalorder %s28_s17, %s28_s17 }
  0x11   :  { %p574_p5 = scmp.ne.s32.totalorder %s28_s17, %s573_s18  ;;  %p579_p7 = scmp.lt.s32.totalorder %s573_s18, %s573_s18 }
  0x13   :  { %p580_p8 = por %p579_p7, %p578_p6 }
  0x15   :  { %p581_p9 = pnand %p580_p8, %p574_p5 }
  0x17   :  { %584 = shalt.err (!%p581_p9)
}
  0x18   :  { %33 = dma.hbm_to_vmem [thread:$0]  %s660_s1, 1664, %s28_s17, [#allocation6], %s612_s12, %s612_s12, %s613_s13  }
  0x19   :  { %605 = dma.done.wait [#allocation3], 256  }
  0x1a   :  { %606 = vsyncadd [#allocation3], 4294967040 }
  0x1b   :  { %607 = dma.done.wait [#allocation6], 1664  }
  0x1c   :  { %608 = vsyncadd [#allocation6], 4294965632  ;;  %v615_v0 = vmov 120   ;;  %vm137_vm0 = vcmask 1042432   ;;  %vm120_vm1 = vcmask 89088   ;;  %v118_v2 = vld [vmem:[#allocation2] sm:$0xff] }
  0x1d   :  { %541 = vset.pattern.permute.xlu0 %v615_v0  ;;  %542 = vset.pattern.permute.xlu1 %v615_v0  ;;  %v119_v1 = vld [vmem:[#allocation2 + $0x8] sm:$0x7]  ;;  %v40_v3 = vld [vmem:[#allocation5] sm:$0xff]  ;;  %v41_v4 = vld [vmem:[#allocation5 + $0x8] sm:$0xff]  ;;  %vm254_vm2 = vcmask 523264   ;;  %v616_v48 = vmov 0.0  }
  0x1e   :  { %484 = vmatprep.subr.msk.mxu0 %vm137_vm0, %v119_v1  ;;  %488 = vmatprep.mubr.msk.f32.mxu0 %vm120_vm1, %v40_v3  ;;  %v45_v5 = vld [vmem:[#allocation5 + $0x28] sm:$0xff]  ;;  %v42_v6 = vld [vmem:[#allocation5 + $0x10] sm:$0xff]  ;;  %v47_v7 = vld [vmem:[#allocation5 + $0x38] sm:$0xff]  ;;  %vm617_vm3 = vmmov 0   ;;  %vm352_vm4 = vcmask 261120   ;;  %s618_s0 = smov [#allocation7]  }
  0x1f   :  { %485 = vmatpush3.msk.msra.mxu0 %vm137_vm0, %v119_v1  ;;  %80 = vperm.xlu1 %542, %v45_v5   ;;  %v43_v8 = vld [vmem:[#allocation5 + $0x18] sm:$0xff]  ;;  %v44_v9 = vld [vmem:[#allocation5 + $0x20] sm:$0xff]  ;;  %v46_v10 = vld [vmem:[#allocation5 + $0x30] sm:$0xff]  ;;  %s433_s1 = sshll.u32 %s618_s0, 4  ;;  %s434_s1 = int_to_ptr.vmem [resolvable:$true] %s433_s1 }
  0x20   :  { %486 = vmatprep.subr.mxu0 %v118_v2  ;;  %90 = vperm.xlu0 %541, %v47_v7   ;;  %v50_v11 = vld [vmem:[#allocation5 + $0x50] sm:$0xff]  ;;  %v51_v12 = vld [vmem:[#allocation5 + $0x58] sm:$0xff]  ;;  %v48_v13 = vld [vmem:[#allocation5 + $0x40] sm:$0xff]  ;;  %s585_s21 = scalar_lea.vmem %s434_s1, 64  ;;  %p590_p11 = scmp.lt.s32.totalorder %s434_s1, %s434_s1 }
  0x21   :  { %487 = vmatpush3.msra.mxu0 %v118_v2  ;;  %v49_v14 = vld [vmem:[#allocation5 + $0x48] sm:$0xff]  ;;  %v648_v15 = vld [vmem:[#allocation5 + $0x60] sm:$0x7]  ;;  %516 = vmatprep.mubr.msk.f32.mxu1 %vm254_vm2, %v48_v13  ;;  %p586_p10 = scmp.ne.s32.totalorder %s434_s1, %s585_s21  ;;  %p591_p12 = scmp.lt.s32.totalorder %s585_s21, %s585_s21 }
  0x22   :  { %489 = vmatmul.mubr.msk.f32.vlgmr.msra.gmra.mxu0 %vm120_vm1, %v41_v4  ;;  %522 = vmatprep.subr.mxu0 %v616_v48 }
  0x23   :  { %491 = vmatprep.mubr.msk.f32.mxu0 %vm120_vm1, %v42_v6  ;;  %75 = vperm.xlu1 %542, %v44_v9   ;;  %p592_p13 = por %p591_p12, %p590_p11 }
  0x24   :  { %85 = vperm.xlu0 %541, %v46_v10  }
  0x25   :  { %p593_p0 = pnand %p592_p13, %p586_p10 }
  0x26   :  { %492 = vmatmul.mubr.msk.f32.gmra.mxu0 %vm120_vm1, %v43_v8 }
  0x27   :  { %494 = vmatprep.mubr.msk.f32.mxu0 %vm120_vm1, %v44_v9  ;;  %65 = vperm.xlu1 %542, %v42_v6  }
  0x28   :  { %70 = vperm.xlu0 %541, %v43_v8  }
  0x2a   :  { %495 = vmatmul.mubr.msk.f32.gmra.mxu0 %vm120_vm1, %v45_v5 }
  0x2b   :  { %497 = vmatprep.mubr.msk.f32.mxu0 %vm120_vm1, %v46_v10  ;;  %55 = vperm.xlu1 %542, %v40_v3  }
  0x2c   :  { %60 = vperm.xlu0 %541, %v41_v4  }
  0x2e   :  { %498 = vmatmul.mubr.msk.f32.gmra.mxu0 %vm120_vm1, %v47_v7 }
  0x2f   :  { %105 = vperm.xlu1 %542, %v50_v11   ;;  %530 = vmatprep.mubr.msk.f32.mxu0 %vm617_vm3, %v616_v48 }
  0x30   :  { %110 = vperm.xlu0 %541, %v51_v12  }
  0x33   :  { %95 = vperm.xlu1 %542, %v48_v13  }
  0x34   :  { %100 = vperm.xlu0 %541, %v49_v14  }
  0x38   :  { %115 = vperm.xlu0 %541, %v648_v15  }
  0x9a   :  { %v81_v18 = vpop.permute.xlu1 %80 }
  0x9b   :  { %v91_v19 = vpop.permute.xlu0 %90 }
  0x9e   :  { %v76_v23 = vpop.permute.xlu1 %75 }
  0x9f   :  { %v86_v24 = vpop.permute.xlu0 %85 }
  0xa2   :  { %v66_v33 = vpop.permute.xlu1 %65 }
  0xa3   :  { %v71_v32 = vpop.permute.xlu0 %70 }
  0xa6   :  { %v56_v41 = vpop.permute.xlu1 %55 }
  0xa7   :  { %v61_v40 = vpop.permute.xlu0 %60 }
  0xaa   :  { %v106_v51 = vpop.permute.xlu1 %105 }
  0xab   :  { %v111_v49 = vpop.permute.xlu0 %110 }
  0xae   :  { %v96_v60 = vpop.permute.xlu1 %95 }
  0xaf   :  { %v101_v55 = vpop.permute.xlu0 %100 }
  0xb3   :  { %v116_v1 = vpop.permute.xlu0 %115 }
  0xe2   :  { %v490_v16 = vpop.f32.mrf.mxu0 }
  0xe3   :  { %v213_v42 = vadd.f32 %v490_v16, %v61_v40 }
  0xe4   :  { %v207_v17 = vpop.f32.mrf.mxu0 }
  0xe5   :  { %v208_v44 = vadd.f32 %v207_v17, %v56_v41  ;;  %v247_v46 = vmax.f32 %v213_v42, 0.0 }
  0xe6   :  { %v493_v20 = vpop.f32.mrf.mxu0 }
  0xe7   :  { %v223_v36 = vadd.f32 %v493_v20, %v71_v32  ;;  %v246_v47 = vmax.f32 %v208_v44, 0.0 }
  0xe8   :  { %v217_v21 = vpop.f32.mrf.mxu0 }
  0xe9   :  { %v218_v38 = vadd.f32 %v217_v21, %v66_v33  ;;  %v249_v43 = vmax.f32 %v223_v36, 0.0 }
  0xea   :  { %v496_v22 = vpop.f32.mrf.mxu0 }
  0xeb   :  { %v233_v29 = vadd.f32 %v496_v22, %v81_v18  ;;  %v248_v45 = vmax.f32 %v218_v38, 0.0 }
  0xec   :  { %v227_v25 = vpop.f32.mrf.mxu0 }
  0xed   :  { %v228_v34 = vadd.f32 %v227_v25, %v76_v23  ;;  %v251_v37 = vmax.f32 %v233_v29, 0.0 }
  0xee   :  { %v499_v26 = vpop.f32.mrf.mxu0 }
  0xef   :  { %v243_v27 = vadd.f32 %v499_v26, %v91_v19  ;;  %v250_v39 = vmax.f32 %v228_v34, 0.0 }
  0xf0   :  { %v237_v28 = vpop.f32.mrf.mxu0 }
  0xf1   :  { %v253_v30 = vmax.f32 %v243_v27, 0.0  ;;  %v238_v31 = vadd.f32 %v237_v28, %v86_v24 }
  0xf3   :  { %v252_v35 = vmax.f32 %v238_v31, 0.0  ;;  %500 = vmatprep.subr.mxu1 %v253_v30 }
  0xf4   :  { %501 = vmatpush3.msra.mxu1 %v253_v30 }
  0xf5   :  { %502 = vmatprep.subr.mxu1 %v252_v35 }
  0xf6   :  { %503 = vmatpush3.msra.mxu1 %v252_v35 }
  0xf7   :  { %504 = vmatprep.subr.mxu1 %v251_v37 }
  0xf8   :  { %505 = vmatpush3.msra.mxu1 %v251_v37 }
  0xf9   :  { %506 = vmatprep.subr.mxu1 %v250_v39 }
  0xfa   :  { %507 = vmatpush3.msra.mxu1 %v250_v39 }
  0xfb   :  { %508 = vmatprep.subr.mxu1 %v249_v43 }
  0xfc   :  { %509 = vmatpush3.msra.mxu1 %v249_v43 }
  0xfd   :  { %510 = vmatprep.subr.mxu1 %v248_v45 }
  0xfe   :  { %511 = vmatpush3.msra.mxu1 %v248_v45 }
  0xff   :  { %512 = vmatprep.subr.mxu1 %v247_v46 }
 0x100   :  { %513 = vmatpush3.msra.mxu1 %v247_v46 }
 0x101   :  { %514 = vmatprep.subr.mxu1 %v246_v47 }
 0x102   :  { %515 = vmatpush3.msra.mxu1 %v246_v47 }
 0x103   :  { %517 = vmatmul.mubr.msk.f32.vlgmr.msra.gmra.mxu1 %vm254_vm2, %v49_v14 }
 0x104   :  { %519 = vmatprep.mubr.msk.f32.mxu1 %vm254_vm2, %v50_v11 }
 0x107   :  { %520 = vmatmul.mubr.msk.f32.gmra.mxu1 %vm254_vm2, %v51_v12 }
 0x1c3   :  { %v518_v50 = vpop.f32.mrf.mxu1 }
 0x1c4   :  { %v335_v57 = vadd.f32 %v518_v50, %v101_v55 }
 0x1c5   :  { %v329_v52 = vpop.f32.mrf.mxu1 }
 0x1c6   :  { %v330_v61 = vadd.f32 %v329_v52, %v96_v60  ;;  %v349_v63 = vmax.f32 %v335_v57, 0.0 }
 0x1c7   :  { %v521_v53 = vpop.f32.mrf.mxu1 }
 0x1c8   :  { %v345_v54 = vadd.f32 %v521_v53, %v111_v49  ;;  %v348_v0 = vmax.f32 %v330_v61, 0.0 }
 0x1c9   :  { %v339_v56 = vpop.f32.mrf.mxu1 }
 0x1ca   :  { %v351_v58 = vmax.f32 %v345_v54, 0.0  ;;  %v340_v59 = vadd.f32 %v339_v56, %v106_v51 }
 0x1cc   :  { %v350_v62 = vmax.f32 %v340_v59, 0.0  ;;  %523 = vmatpush3.msra.mxu0 %v351_v58 }
 0x1cd   :  { %524 = vmatprep.subr.mxu0 %v616_v48 }
 0x1ce   :  { %525 = vmatpush3.msra.mxu0 %v350_v62 }
 0x1cf   :  { %526 = vmatprep.subr.mxu0 %v616_v48 }
 0x1d0   :  { %527 = vmatpush3.msra.mxu0 %v349_v63 }
 0x1d1   :  { %528 = vmatprep.subr.mxu0 %v616_v48 }
 0x1d2   :  { %529 = vmatpush3.msra.mxu0 %v348_v0 }
 0x1d3   :  { %531 = vmatmul.mubr.msk.f32.vlgmr.msra.gmra.mxu0 %vm352_vm4, %v648_v15 }
 0x293   :  { %v421_v2 = vpop.f32.mrf.mxu0 }
 0x294   :  { %v422_v3 = vadd.f32 %v421_v2, %v116_v1 }
 0x295   :  { %v532_v4 = vpop.f32.mrf.mxu0 }
 0x296   :  { %543 = vtanh.f32 %v422_v3 }
 0x2a3   :  { %v544_v5 = vpop.eup %543 }
 0x2a4   :  { %426 = vst [vmem:[#allocation7] sm:$0x7] %v544_v5 }
 0x2a5   :  { %596 = shalt.err (!%p593_p0)
}
 0x2a6   :  { %436 = dma.vmem_to_hbm [thread:$0]  %s434_s1, 64, %s661_s2, [#allocation4]  }
 0x2a7   :  { %609 = dma.done.wait [#allocation4], 64  }
 0x2a8   :  { %610 = vsyncadd [#allocation4], 4294967232 }
 0x2a9   :  { %440 = vsyncpa [#allocation3], 1 }
 0x2aa   :  { %441 = vsyncpa [#allocation6], 1 }
 0x2ab   :  { %442 = vsyncpa [#allocation4], 1 }

</bundles_post_ra>
